<compile_context>
chip_gen: v5e
topology: v5e:2x2
jax: 0.10.0
libtpu: 0.0.40
codegen_flags: <defaults>
</compile_context>

<pallas_src>
import functools

import jax
import jax.numpy as jnp
from jax import lax
from jax.experimental import pallas as pl
from jax.experimental.pallas import tpu as pltpu


def _round_up(x, m):
    return ((x + m - 1) // m) * m


def _gumbel_softmax_kernel(logits_ref, u_ref, out_ref, union_ref, *,
                           temperature, eps, hard, num_valid_rows, mask_rows):
    """Processes one (block_rows, n_pad) batch tile.

    The grid walks batch tiles in reverse order, so the tile containing global
    row 0 is processed last, after the argmax-column union over the whole batch
    has been accumulated into `union_ref`.
    """
    step = pl.program_id(0)
    nsteps = pl.num_programs(0)
    blk_b, n_pad = logits_ref.shape
    blk = nsteps - 1 - step                       # batch tile handled this step

    # ---- Gumbel noise:  g = -log(-log(U + eps) + eps) ----------------------
    u = u_ref[...]
    g = -jnp.log(-jnp.log(u + jnp.float32(eps)) + jnp.float32(eps))
    y = logits_ref[...].astype(jnp.float32) + g   # (blk_b, n_pad)

    if not hard:
        # Soft path: plain softmax((logits + g) / T) along the class axis.
        z = y / jnp.float32(temperature)
        z = z - jnp.max(z, axis=1, keepdims=True)
        e = jnp.exp(z)
        out_ref[...] = (e / jnp.sum(e, axis=1, keepdims=True)).astype(out_ref.dtype)
        return

    @pl.when(step == 0)
    def _init():
        union_ref[...] = jnp.zeros(union_ref.shape, union_ref.dtype)

    # ---- per-row argmax: softmax and /T are monotone, so argmax(dist) == argmax(y)
    col_ids = lax.broadcasted_iota(jnp.int32, (blk_b, n_pad), 1)
    row_max = jnp.max(y, axis=1, keepdims=True)
    cand = jnp.where(y == row_max, col_ids, jnp.int32(n_pad))   # first occurrence
    idx = jnp.min(cand, axis=1, keepdims=True)                  # (blk_b, 1)
    onehot = (col_ids == idx).astype(jnp.float32)               # (blk_b, n_pad)

    if mask_rows:
        # Exclude padded batch rows from the argmax-column union.
        g_rows = lax.broadcasted_iota(jnp.int32, (blk_b, 1), 0) + blk * blk_b
        onehot = jnp.where(g_rows < num_valid_rows, onehot, jnp.float32(0.0))

    union_ref[...] = jnp.maximum(union_ref[...],
                                 jnp.max(onehot, axis=0, keepdims=True))

    # Every row except global row 0 is exactly (0 - dist) + dist == 0,
    # so no softmax is needed for them.
    out_ref[...] = jnp.zeros(out_ref.shape, out_ref.dtype)

    @pl.when(step == nsteps - 1)
    def _finalize():
        # Last step == batch tile 0, which holds global row 0.
        z0 = y[0:1, :] / jnp.float32(temperature)
        z0 = z0 - jnp.max(z0, axis=1, keepdims=True)
        e0 = jnp.exp(z0)
        dist0 = e0 / jnp.sum(e0, axis=1, keepdims=True)          # (1, n_pad)
        # Same op order as the PyTorch reference: (y_hard - y_no_grad) + y.
        out_ref[0:1, :] = ((union_ref[...] - dist0) + dist0).astype(out_ref.dtype)


def gumbel_softmax_sampling(logits, uniform_noise, *, temperature=30.0,
                            hard=True, block_rows=None):
    """Pallas implementation of GumbelSoftmaxSampling.forward for 2-D logits.

    `uniform_noise` is U ~ Uniform[0,1) with the same shape as `logits`
    (matches the external `torch.FloatTensor(...).uniform_(0,1)` draw).
    """
    logits = jnp.asarray(logits, jnp.float32)
    u = jnp.asarray(uniform_noise, jnp.float32)
    assert logits.ndim == 2 and logits.shape == u.shape
    B, N = logits.shape

    # Lane-dense class axis: pad to a multiple of 128.
    n_pad = max(128, _round_up(N, 128))

    # Batch tile size: ~1 MiB fp32 per (block_rows, n_pad) buffer.  With
    # 2 inputs + 1 output, double-buffered, that is ~6 MiB resident -- well
    # inside the scoped-VMEM limits on v5e (16 MiB), v6e (32 MiB) and v7x
    # (32 MiB scoped / 64 MiB phys), while keeping the ~0.35 us/step grid
    # overhead negligible.
    if block_rows is None:
        block_rows = (1 << 18) // n_pad                 # ~1 MiB fp32 target
        block_rows = max(8, min(2048, (block_rows // 8) * 8))
    block_rows = max(8, min(block_rows, _round_up(B, 8)))
    nb = -(-B // block_rows)                       # number of batch tiles
    block_rows = _round_up(-(-B // nb), 8)         # minimize row padding
    b_pad = block_rows * nb

    # Pad: logits with a large negative (never wins argmax, exp underflows to 0),
    # noise with 0.5 (harmless).
    lp = jnp.pad(logits, ((0, b_pad - B), (0, n_pad - N)), constant_values=-1e30)
    up = jnp.pad(u, ((0, b_pad - B), (0, n_pad - N)), constant_values=0.5)

    kernel = functools.partial(
        _gumbel_softmax_kernel,
        temperature=float(temperature),
        eps=1e-20,
        hard=bool(hard),
        num_valid_rows=B,
        mask_rows=(b_pad != B),
    )

    def mkspec():
        # Reverse iteration order: tile 0 (holding row 0) is processed last.
        return pl.BlockSpec((block_rows, n_pad), lambda i, _nb=nb: (_nb - 1 - i, 0))

    out = pl.pallas_call(
        kernel,
        out_shape=jax.ShapeDtypeStruct((b_pad, n_pad), jnp.float32),
        grid=(nb,),
        in_specs=[mkspec(), mkspec()],
        out_specs=mkspec(),
        scratch_shapes=[pltpu.VMEM((1, n_pad), jnp.float32)],   # argmax-column union
        compiler_params=pltpu.CompilerParams(
            dimension_semantics=("arbitrary",),                 # union accumulates sequentially
            vmem_limit_bytes=32 * 1024 * 1024,
        ),
    )(lp, up)
    return out[:B, :N]


if __name__ == "__main__":
    key = jax.random.PRNGKey(0)
    k_logits, k_noise = jax.random.split(key)

    B, N = 4, 16                    # (batch, num_choices) seen by this routing layer
    T = 30.0
    logits = jax.random.normal(k_logits, (B, N), dtype=jnp.float32) * 2.0
    u = jax.random.uniform(k_noise, (B, N), dtype=jnp.float32)

    out_hard = jax.block_until_ready(
        gumbel_softmax_sampling(logits, u, temperature=T, hard=True))
    out_soft = jax.block_until_ready(
        gumbel_softmax_sampling(logits, u, temperature=T, hard=False))

    # ---- pure-JAX reference of the PyTorch forward --------------------------
    eps = 1e-20
    g = -jnp.log(-jnp.log(u + eps) + eps)
    y = logits + g
    dist = jax.nn.softmax(y / T, axis=1)
    idx = jnp.argmax(dist, axis=-1)                       # per-row argmax
    y_hard = jnp.zeros_like(dist).at[0, idx].set(1.0)     # row-0-only scatter (torch quirk)
    ref_hard = (y_hard - dist) + dist
    ref_soft = dist

    assert out_hard.shape == (B, N) and out_hard.dtype == jnp.float32
    assert bool(jnp.all(jnp.isfinite(out_hard)))
    assert float(jnp.max(jnp.abs(out_hard - ref_hard))) < 1e-5
    assert float(jnp.max(jnp.abs(out_soft - ref_soft))) < 1e-5
    assert float(jnp.max(jnp.abs(out_hard[1:]))) < 1e-6   # rows >= 1 are exactly zero
    assert float(jnp.max(out_hard[0])) > 0.99             # row 0 carries the one-hot union

    # Larger shape exercising multiple batch tiles (union spans grid steps).
    B2, N2 = 3000, 200
    k2a, k2b = jax.random.split(jax.random.PRNGKey(1))
    logits2 = jax.random.normal(k2a, (B2, N2), dtype=jnp.float32) * 3.0
    u2 = jax.random.uniform(k2b, (B2, N2), dtype=jnp.float32)
    out2 = jax.block_until_ready(
        gumbel_softmax_sampling(logits2, u2, temperature=T, hard=True, block_rows=512))
    g2 = -jnp.log(-jnp.log(u2 + eps) + eps)
    y2 = logits2 + g2
    dist2 = jax.nn.softmax(y2 / T, axis=1)
    idx2 = jnp.argmax(dist2, axis=-1)
    yh2 = jnp.zeros_like(dist2).at[0, idx2].set(1.0)
    ref2 = (yh2 - dist2) + dist2
    assert float(jnp.max(jnp.abs(out2 - ref2))) < 1e-5

    print("KERNEL_OK")
</pallas_src>

<mosaic_0001>
module attributes {stable_mosaic.version = 11 : i64} {
  func.func @_gumbel_softmax_kernel(%arg0: i32, %arg1: memref<8x128xf32, #tpu.memory_space<vmem>>, %arg2: memref<8x128xf32, #tpu.memory_space<vmem>>, %arg3: memref<8x128xf32, #tpu.memory_space<vmem>>, %arg4: memref<1x128xf32, #tpu.memory_space<vmem>>) attributes {dimension_semantics = [#tpu.dimension_semantics<arbitrary>], iteration_bounds = array<i64: 1>, scalar_prefetch = 0 : i64, scratch_operands = 1 : i64, tpu.core_type = #tpu.core_type<tc>, window_params = [{transform_indices = @transform_0, window_bounds = array<i64: 8, 128>}, {transform_indices = @transform_1, window_bounds = array<i64: 8, 128>}, {transform_indices = @transform_2, window_bounds = array<i64: 8, 128>}]} {
    %c0_i32 = arith.constant 0 : i32
    %0 = arith.subi %c0_i32, %arg0 : i32
    %c0 = arith.constant 0 : index
    %c0_0 = arith.constant 0 : index
    %1 = vector.load %arg2[%c0, %c0_0] : memref<8x128xf32, #tpu.memory_space<vmem>>, vector<8x128xf32>
    %cst = arith.constant 9.99999968E-21 : f32
    %2 = vector.broadcast %cst : f32 to vector<8x128xf32>
    %3 = arith.addf %1, %2 : vector<8x128xf32>
    %4 = math.log %3 : vector<8x128xf32>
    %cst_1 = arith.constant 0.000000e+00 : f32
    %5 = vector.broadcast %cst_1 : f32 to vector<8x128xf32>
    %6 = arith.subf %5, %4 : vector<8x128xf32>
    %cst_2 = arith.constant 9.99999968E-21 : f32
    %7 = vector.broadcast %cst_2 : f32 to vector<8x128xf32>
    %8 = arith.addf %6, %7 : vector<8x128xf32>
    %9 = math.log %8 : vector<8x128xf32>
    %cst_3 = arith.constant 0.000000e+00 : f32
    %10 = vector.broadcast %cst_3 : f32 to vector<8x128xf32>
    %11 = arith.subf %10, %9 : vector<8x128xf32>
    %c0_4 = arith.constant 0 : index
    %c0_5 = arith.constant 0 : index
    %12 = vector.load %arg1[%c0_4, %c0_5] : memref<8x128xf32, #tpu.memory_space<vmem>>, vector<8x128xf32>
    %13 = arith.addf %12, %11 : vector<8x128xf32>
    %c0_i32_6 = arith.constant 0 : i32
    %14 = arith.cmpi eq, %arg0, %c0_i32_6 : i32
    %15 = arith.extui %14 : i1 to i32
    %c0_i32_7 = arith.constant 0 : i32
    %16 = arith.cmpi ne, %15, %c0_i32_7 : i32
    scf.if %16 {
      %cst_21 = arith.constant 0.000000e+00 : f32
      %50 = vector.broadcast %cst_21 : f32 to vector<1x128xf32>
      %c0_22 = arith.constant 0 : index
      %c0_23 = arith.constant 0 : index
      %51 = vector.load %arg4[%c0_22, %c0_23] : memref<1x128xf32, #tpu.memory_space<vmem>>, vector<1x128xf32>
      tpu.vector_store %arg4[%c0_22, %c0_23], %50 {strides = array<i32>} : memref<1x128xf32, #tpu.memory_space<vmem>>, vector<1x128xf32>,
    } else {
    }
    %17 = tpu.iota {dimensions = array<i32: 1>} : vector<8x128xi32>
    %cst_8 = arith.constant dense<0xFF800000> : vector<8xf32>
    %18 = vector.multi_reduction <maximumf>, %13, %cst_8 [1] : vector<8x128xf32> to vector<8xf32>
    %19 = vector.shape_cast %18 : vector<8xf32> to vector<8x1xf32>
    %20 = vector.broadcast %19 : vector<8x1xf32> to vector<8x128xf32>
    %21 = arith.cmpf oeq, %13, %20 : vector<8x128xf32>
    %c128_i32 = arith.constant 128 : i32
    %22 = vector.broadcast %c128_i32 : i32 to vector<8x128xi32>
    %23 = arith.select %21, %17, %22 : vector<8x128xi1>, vector<8x128xi32>
    %cst_9 = arith.constant dense<2147483647> : vector<8xi32>
    %24 = vector.multi_reduction <minsi>, %23, %cst_9 [1] : vector<8x128xi32> to vector<8xi32>
    %25 = vector.shape_cast %24 : vector<8xi32> to vector<8x1xi32>
    %26 = vector.broadcast %25 : vector<8x1xi32> to vector<8x128xi32>
    %27 = arith.cmpi eq, %17, %26 : vector<8x128xi32>
    %28 = arith.extui %27 : vector<8x128xi1> to vector<8x128xi32>
    %29 = arith.sitofp %28 : vector<8x128xi32> to vector<8x128xf32>
    %30 = tpu.iota {dimensions = array<i32: 0>} : vector<8x1xi32>
    %c8_i32 = arith.constant 8 : i32
    %31 = arith.muli %0, %c8_i32 : i32
    %32 = vector.broadcast %31 : i32 to vector<8x1xi32>
    %33 = arith.addi %30, %32 : vector<8x1xi32>
    %c4_i32 = arith.constant 4 : i32
    %34 = vector.broadcast %c4_i32 : i32 to vector<8x1xi32>
    %35 = arith.cmpi slt, %33, %34 : vector<8x1xi32>
    %cst_10 = arith.constant 0.000000e+00 : f32
    %36 = vector.shape_cast %35 : vector<8x1xi1> to vector<8x1xi1>
    %37 = vector.broadcast %36 : vector<8x1xi1> to vector<8x128xi1>
    %38 = vector.broadcast %cst_10 : f32 to vector<8x128xf32>
    %39 = arith.select %37, %29, %38 : vector<8x128xi1>, vector<8x128xf32>
    %c0_11 = arith.constant 0 : index
    %c0_12 = arith.constant 0 : index
    %40 = vector.load %arg4[%c0_11, %c0_12] : memref<1x128xf32, #tpu.memory_space<vmem>>, vector<1x128xf32>
    %cst_13 = arith.constant dense<0xFF800000> : vector<128xf32>
    %41 = vector.multi_reduction <maximumf>, %39, %cst_13 [0] : vector<8x128xf32> to vector<128xf32>
    %42 = vector.shape_cast %41 : vector<128xf32> to vector<1x128xf32>
    %43 = arith.maximumf %40, %42 : vector<1x128xf32>
    %c0_14 = arith.constant 0 : index
    %c0_15 = arith.constant 0 : index
    %44 = vector.load %arg4[%c0_14, %c0_15] : memref<1x128xf32, #tpu.memory_space<vmem>>, vector<1x128xf32>
    tpu.vector_store %arg4[%c0_14, %c0_15], %43 {strides = array<i32>} : memref<1x128xf32, #tpu.memory_space<vmem>>, vector<1x128xf32>,
    %cst_16 = arith.constant 0.000000e+00 : f32
    %45 = vector.broadcast %cst_16 : f32 to vector<8x128xf32>
    %c0_17 = arith.constant 0 : index
    %c0_18 = arith.constant 0 : index
    %46 = vector.load %arg3[%c0_17, %c0_18] : memref<8x128xf32, #tpu.memory_space<vmem>>, vector<8x128xf32>
    tpu.vector_store %arg3[%c0_17, %c0_18], %45 {strides = array<i32>} : memref<8x128xf32, #tpu.memory_space<vmem>>, vector<8x128xf32>,
    %c0_i32_19 = arith.constant 0 : i32
    %47 = arith.cmpi eq, %arg0, %c0_i32_19 : i32
    %48 = arith.extui %47 : i1 to i32
    %c0_i32_20 = arith.constant 0 : i32
    %49 = arith.cmpi ne, %48, %c0_i32_20 : i32
    scf.if %49 {
      %50 = vector.extract_strided_slice %13 {offsets = [0, 0], sizes = [1, 128], strides = [1, 1]} : vector<8x128xf32> to vector<1x128xf32>
      %cst_21 = arith.constant 3.000000e+01 : f32
      %51 = vector.broadcast %cst_21 : f32 to vector<1x128xf32>
      %52 = arith.divf %50, %51 : vector<1x128xf32>
      %cst_22 = arith.constant dense<0xFF800000> : vector<1xf32>
      %53 = vector.multi_reduction <maximumf>, %52, %cst_22 [1] : vector<1x128xf32> to vector<1xf32>
      %54 = vector.shape_cast %53 : vector<1xf32> to vector<1x1xf32>
      %55 = vector.broadcast %54 : vector<1x1xf32> to vector<1x128xf32>
      %56 = arith.subf %52, %55 : vector<1x128xf32>
      %57 = math.exp %56 : vector<1x128xf32>
      %cst_23 = arith.constant dense<0.000000e+00> : vector<1xf32>
      %58 = vector.multi_reduction <add>, %57, %cst_23 [1] : vector<1x128xf32> to vector<1xf32>
      %59 = vector.shape_cast %58 : vector<1xf32> to vector<1x1xf32>
      %60 = vector.broadcast %59 : vector<1x1xf32> to vector<1x128xf32>
      %61 = arith.divf %57, %60 : vector<1x128xf32>
      %c0_24 = arith.constant 0 : index
      %c0_25 = arith.constant 0 : index
      %62 = vector.load %arg4[%c0_24, %c0_25] : memref<1x128xf32, #tpu.memory_space<vmem>>, vector<1x128xf32>
      %63 = arith.subf %62, %61 : vector<1x128xf32>
      %64 = arith.addf %63, %61 : vector<1x128xf32>
      %c0_26 = arith.constant 0 : index
      %c0_27 = arith.constant 0 : index
      %65 = vector.load %arg3[%c0_26, %c0_27] : memref<8x128xf32, #tpu.memory_space<vmem>>, vector<1x128xf32>
      tpu.vector_store %arg3[%c0_26, %c0_27], %64 {strides = array<i32>} : memref<8x128xf32, #tpu.memory_space<vmem>>, vector<1x128xf32>,
    } else {
    }
    return
  }
  func.func @transform_0(%arg0: i32) -> (i32, i32) {
    %c0_i32 = arith.constant 0 : i32
    %0 = arith.subi %c0_i32, %arg0 : i32
    %c0_i32_0 = arith.constant 0 : i32
    %c0_i32_1 = arith.constant 0 : i32
    return %0, %c0_i32_0 : i32, i32
  }
  func.func @transform_1(%arg0: i32) -> (i32, i32) {
    %c0_i32 = arith.constant 0 : i32
    %0 = arith.subi %c0_i32, %arg0 : i32
    %c0_i32_0 = arith.constant 0 : i32
    %c0_i32_1 = arith.constant 0 : i32
    return %0, %c0_i32_0 : i32, i32
  }
  func.func @transform_2(%arg0: i32) -> (i32, i32) {
    %c0_i32 = arith.constant 0 : i32
    %0 = arith.subi %c0_i32, %arg0 : i32
    %c0_i32_0 = arith.constant 0 : i32
    %c0_i32_1 = arith.constant 0 : i32
    return %0, %c0_i32_0 : i32, i32
  }
}

</mosaic_0001>

<bundles_post_ra>
// kernel: tpu_custom_call.1
= control target key start
LH: loop header
LB: loop body
LE: loop exit
PB: predicated region body
PF: predicated region fallthrough
CT: control target
= control target key end

     0   :  { %7 = vsyncpa [#allocation4], 0  ;;  %s300_s0 = inlined_call_operand.hbm [shape: f32[8,128], index: 0, kind: input, shape index: {}]   ;;  %s301_s1 = inlined_call_operand.hbm [shape: f32[8,128], index: 1, kind: input, shape index: {}]   ;;  %s302_s2 = inlined_call_operand.hbm [shape: f32[8,128], index: 2, kind: output, shape index: {}]  }
   0x1   :  { %8 = vsyncpa [#allocation7], 0 }
   0x2   :  { %9 = vsyncpa [#allocation5], 0  ;;  %s18_s11 = sshll.u32 %s300_s0, 4  ;;  %s269_s12 = smov [#allocation3]   ;;  %s19_s11 = int_to_ptr.hbm [resolvable:$true] %s18_s11 }
   0x3   :  { %s20_s13 = sshll.u32 %s269_s12, 4  ;;  %s32_s16 = sshll.u32 %s301_s1, 4  ;;  %s21_s13 = int_to_ptr.vmem [resolvable:$true] %s20_s13  ;;  %s33_s16 = int_to_ptr.hbm [resolvable:$true] %s32_s16 }
   0x4   :  { %23 = dma.hbm_to_vmem [thread:$0]  %s19_s11, 128, %s21_s13, [#allocation4]  }
   0x5   :  { %s270_s17 = smov [#allocation6]  }
   0x6   :  { %s34_s18 = sshll.u32 %s270_s17, 4  ;;  %s35_s18 = int_to_ptr.vmem [resolvable:$true] %s34_s18 }
   0x7   :  { %37 = dma.hbm_to_vmem [thread:$0]  %s33_s16, 128, %s35_s18, [#allocation7]  }
   0x8   :  { %263 = dma.done.wait [#allocation4], 128  }
   0x9   :  { %264 = vsyncadd [#allocation4], 4294967168 }
   0xa   :  { %265 = dma.done.wait [#allocation7], 128  }
   0xb   :  { %266 = vsyncadd [#allocation7], 4294967168  ;;  %v50_v0 = vld [vmem:[#allocation6] sm:$0xff]  ;;  %v271_v2 = vmov 30.0   ;;  %v59_v14 = vld [vmem:[#allocation3] sm:$0xff]  ;;  %vm119_vm1 = vcmask 1040384   ;;  %v66_v20 = vlaneseq }
   0xc   :  { %v51_v1 = vadd.f32 1e-20, %v50_v0  ;;  %181 = vrcp.f32 %v271_v2  ;;  %v272_v32 = vmov 0.0   ;;  %s273_s0 = smov [#allocation8]   ;;  %s158_s21 = sshll.u32 %s302_s2, 4  ;;  %s159_s21 = int_to_ptr.hbm [resolvable:$true] %s158_s21 }
   0xd   :  { %v67_v21 = vand.u32 127, %v66_v20  ;;  %65 = vst [vmem:[#allocation2] sm:$0x1] %v272_v32  ;;  %v90_v38 = vshrl.u32 %v66_v20, 7  ;;  %s156_s1 = sshll.u32 %s273_s0, 4  ;;  %s157_s1 = int_to_ptr.vmem [resolvable:$true] %s156_s1 }
   0xe   :  { %183 = vlog2.f32 %v51_v1  ;;  %107 = vst [vmem:[#allocation8] sm:$0xff] %v272_v32 }
   0xf   :  { %vm94_vm4 = vcmp.lt.s32.totalorder %v90_v38, 4 }
  0x12   :  { %v182_v3 = vpop.eup %181 }
  0x13   :  { %v112_v6 = vmul.f32 30.0, %v182_v3  ;;  %vm116_vm0 = vweird.f32 %v182_v3 }
  0x14   :  { %v184_v4 = vpop.eup %183  ;;  %v98_v55 = vld [vmem:[#allocation2] sm:$0x1] }
  0x15   :  { %v53_v5 = vmul.f32 0.6931472, %v184_v4  ;;  %v113_v9 = vsub.f32 1.0, %v112_v6 }
  0x17   :  { %v54_v7 = vsub.f32 0.0, %v53_v5  ;;  %v114_v10 = vmul.f32 %v182_v3, %v113_v9 }
  0x19   :  { %v55_v8 = vadd.f32 1e-20, %v54_v7  ;;  %v115_v12 = vadd.f32 %v182_v3, %v114_v10 }
  0x1b   :  { %185 = vlog2.f32 %v55_v8  ;;  %v117_v16 = vsel %vm116_vm0, %v182_v3, %v115_v12 }
  0x21   :  { %v186_v11 = vpop.eup %185 }
  0x22   :  { %v57_v13 = vmul.f32 0.6931472, %v186_v11 }
  0x24   :  { %v58_v15 = vsub.f32 0.0, %v57_v13 }
  0x26   :  { %v60_v17 = vadd.f32 %v59_v14, %v58_v15 }
  0x28   :  { %68 = vmax.xlane.f32.xlu0 %v60_v17  ;;  %v118_v18 = vmul.f32 %v117_v16, %v60_v17 }
  0x2a   :  { %v120_v19 = vsel %vm119_vm1, %v118_v18, -inf }
  0x2b   :  { %121 = vmax.xlane.f32.xlu1 %v120_v19 }
  0x9b   :  { %v69_v22 = vpop.xlane.xlu0 %68 }
  0x9c   :  { %vm70_vm2 = vcmp.eq.f32.partialorder %v60_v17, %v69_v22 }
  0x9d   :  { %v71_v23 = vsel %vm70_vm2, %v67_v21, 128 }
  0x9e   :  { %v122_v24 = vpop.xlane.xlu1 %121  ;;  %v73_v25 = vshra.s32 %v71_v23, 16  ;;  %v72_v31 = vand.u32 65535, %v71_v23 }
  0x9f   :  { %v123_v26 = vsub.f32 %v118_v18, %v122_v24 }
  0xa0   :  { %v75_v27 = vcvt.s32.f32 %v73_v25  ;;  %v74_v34 = vcvt.s32.f32 %v72_v31 }
  0xa1   :  { %v124_v28 = vmul.f32 1.442695, %v123_v26 }
  0xa2   :  { %76 = vmin.xlane.f32.xlu0 %v75_v27 }
  0xa3   :  { %187 = vpow2.f32 %v124_v28 }
  0xa9   :  { %v188_v29 = vpop.eup %187 }
  0xaa   :  { %v126_v30 = vsel %vm119_vm1, %v188_v29, 0.0 }
  0xab   :  { %127 = vadd.xlane.f32.xlu2 %v126_v30 }
 0x115   :  { %v77_v33 = vpop.xlane.xlu0 %76 }
 0x116   :  { %vm78_vm3 = vcmp.eq.f32.partialorder %v75_v27, %v77_v33  ;;  %v83_v37 = vcvt.f32.s32 %v77_v33 }
 0x117   :  { %v79_v35 = vsel %vm78_vm3, %v74_v34, inf }
 0x118   :  { %80 = vmin.xlane.f32.xlu1 %v79_v35  ;;  %v84_v40 = vshll.u32 %v83_v37, 16 }
 0x11e   :  { %v128_v36 = vpop.xlane.xlu2 %127 }
 0x11f   :  { %189 = vrcp.f32 %v128_v36  ;;  %vm134_vm6 = vweird.f32 %v128_v36  ;;  %v140_v54 = vand.u32 2147483648, %v128_v36  ;;  %v138_v57 = vand.u32 2147483647, %v128_v36 }
 0x121   :  { %v141_v60 = vor.u32 1.1754944e-38, %v140_v54  ;;  %vm139_vm9 = vcmp.eq.f32.partialorder %v138_v57, 8.507059e+37 }
 0x125   :  { %v190_v42 = vpop.eup %189 }
 0x126   :  { %v130_v44 = vmul.f32 %v190_v42, %v128_v36  ;;  %vm135_vm7 = vweird.f32 %v190_v42 }
 0x127   :  { %vm136_vm8 = vmor %vm134_vm6, %vm135_vm7 }
 0x128   :  { %v131_v48 = vsub.f32 1.0, %v130_v44 }
 0x12a   :  { %v132_v51 = vmul.f32 %v190_v42, %v131_v48 }
 0x12c   :  { %v133_v56 = vadd.f32 %v190_v42, %v132_v51 }
 0x12e   :  { %v137_v61 = vsel %vm136_vm8, %v190_v42, %v133_v56 }
 0x12f   :  { %v142_v62 = vsel %vm139_vm9, %v141_v60, %v137_v61 }
 0x130   :  { %v143_v63 = vmul.f32 %v188_v29, %v142_v62 }
 0x18b   :  { %v81_v39 = vpop.xlane.xlu1 %80 }
 0x18c   :  { %v82_v41 = vcvt.f32.s32 %v81_v39 }
 0x18e   :  { %v85_v43 = vadd.s32 %v84_v40, %v82_v41 }
 0x190   :  { %vm86_vm5 = vcmp.eq.s32.totalorder %v67_v21, %v85_v43 }
 0x191   :  { %v175_v45 = vsel %vm86_vm5, 1.0, %v272_v32 }
 0x192   :  { %v97_v46 = vsel %vm94_vm4, %v175_v45, 0.0 }
 0x193   :  { %v99_v47 = vrot.slane %v97_v46, 4 }
 0x195   :  { %v100_v49 = vmax.f32 %v97_v46, %v99_v47 }
 0x197   :  { %v101_v50 = vrot.slane %v100_v49, 2 }
 0x199   :  { %v102_v52 = vmax.f32 %v100_v49, %v101_v50 }
 0x19b   :  { %v103_v53 = vrot.slane %v102_v52, 1 }
 0x19d   :  { %v104_v58 = vmax.f32 %v102_v52, %v103_v53 }
 0x19f   :  { %v105_v59 = vmax.f32 %v98_v55, %v104_v58 }
 0x1a1   :  { %106 = vst [vmem:[#allocation2] sm:$0x1] %v105_v59 }
 0x1a8   :  { %v144_v0 = vld [vmem:[#allocation2] sm:$0x1] }
 0x1a9   :  { %v145_v1 = vsub.f32 %v144_v0, %v143_v63 }
 0x1ab   :  { %v146_v2 = vadd.f32 %v145_v1, %v143_v63 }
 0x1ad   :  { %147 = vst [vmem:[#allocation8] sm:$0x1] %v146_v2 }
 0x1ae   :  { %161 = dma.vmem_to_hbm [thread:$0]  %s157_s1, 128, %s159_s21, [#allocation5]  }
 0x1af   :  { %267 = dma.done.wait [#allocation5], 128  }
 0x1b0   :  { %268 = vsyncadd [#allocation5], 4294967168 }
 0x1b1   :  { %166 = vsyncpa [#allocation4], 1 }
 0x1b2   :  { %167 = vsyncpa [#allocation7], 1 }
 0x1b3   :  { %168 = vsyncpa [#allocation5], 1 }

</bundles_post_ra>
